<compile_context>
chip_gen: v5e
topology: v5e:2x2
jax: 0.10.0
libtpu: 0.0.40
codegen_flags: <defaults>
</compile_context>

<pallas_src>
import functools
import math

import jax
import jax.numpy as jnp
from jax.experimental import pallas as pl
from jax.experimental.pallas import tpu as pltpu


# ----------------------------------------------------------------- utilities

def _round_up(x, m):
    return ((x + m - 1) // m) * m


def eca_kernel_size(channels, gamma=2, b=1):
    kernel_size = int(abs((math.log(channels, 2) + b) / gamma))
    kernel_size = kernel_size if kernel_size % 2 else kernel_size + 1
    return kernel_size


def _vmem_capacity_bytes():
    """Physical VMEM per core, with a generation-aware fallback."""
    try:
        info = pltpu.get_tpu_info()
        for name in ("vmem_capacity_bytes", "vmem_size_bytes", "vmem_bytes"):
            val = getattr(info, name, None)
            if val:
                return int(val)
    except Exception:
        pass
    try:
        kind = jax.devices()[0].device_kind.lower()
    except Exception:
        kind = ""
    if "v7" in kind:
        return 64 * 1024 * 1024            # v7x: 64 MiB per TensorCore
    if any(t in kind for t in ("v4", "v5", "v6")):
        return 128 * 1024 * 1024           # v4 / v5e / v6e: 128 MiB
    return 64 * 1024 * 1024                # unknown: conservative


# -------------------------------------------------------------- conv helper

def _conv1d_same(pooled, w_ref, k):
    """k-tap 'same' Conv1d along the channel (sublane) axis of a (C, 1) vector.

    out[c] = sum_t w[t] * pooled[c + t - pad], zero-padded at the boundaries.
    Implemented as k VPU FMAs on sublane-rotated copies (pltpu.roll), with the
    wrapped-around boundary taps masked to zero.  No (C, C) matrix, no MXU.
    """
    c = pooled.shape[0]
    pad = (k - 1) // 2
    ch = jax.lax.broadcasted_iota(jnp.int32, pooled.shape, 0)   # (C, 1) channel ids
    out = jnp.zeros_like(pooled)
    for t in range(k):                       # k is a small static Python int (3..7)
        off = t - pad                        # source channel = c + off
        if off == 0:
            shifted = pooled
        else:
            shifted = pltpu.roll(pooled, shift=(-off) % c, axis=0)
            src = ch + off
            shifted = jnp.where((src >= 0) & (src < c), shifted, 0.0)
        out = out + w_ref[t] * shifted       # scalar (SMEM) * vector FMA
    return out


# ------------------------------------------------------------------- kernels

def _fused_kernel(x_ref, w_ref, o_ref, *, k, inv_hw):
    """Single-pass kernel: one full (C, HW) slab per batch element.

    x_ref / o_ref : (C, HW)  (block == full array dims -> no padding, no masks)
    w_ref         : (k,) f32 in SMEM
    """
    x = x_ref[...]
    # avg-pool accumulates in f32; max-pool is exact in the native dtype.
    s = jnp.sum(x.astype(jnp.float32), axis=1, keepdims=True)
    m = jnp.max(x, axis=1, keepdims=True).astype(jnp.float32)
    pooled = s * inv_hw + m                   # conv(avg)+conv(max) == conv(avg+max)
    v = jax.nn.sigmoid(_conv1d_same(pooled, w_ref, k))          # (C, 1) f32
    # Broadcast multiply in the input dtype (bf16 stays bf16; no f32 slab copy
    # is kept live through the store).
    o_ref[...] = (x * v.astype(x.dtype)).astype(o_ref.dtype)


def _reduce_kernel(x_ref, w_ref, v_ref, sum_sc, max_sc, *, k, hw_true, inv_hw):
    """Pass 1 of the HW-tiled fallback: pooled stats + conv + sigmoid -> v.

    Grid (N, HW tiles). x_ref: (C, T); v_ref: (C, 1) f32; scratch: (C, 1) f32 each.
    The spatial padding (wrapper zero-pad to a tile multiple) never needs a sum
    mask; the max mask only runs on the last tile.
    """
    j = pl.program_id(1)
    nj = pl.num_programs(1)
    tile = x_ref.shape[1]

    @pl.when(j == 0)
    def _():
        sum_sc[...] = jnp.zeros_like(sum_sc)
        max_sc[...] = jnp.full_like(max_sc, -jnp.inf)

    x = x_ref[...]
    sum_sc[...] = sum_sc[...] + jnp.sum(x.astype(jnp.float32), axis=1, keepdims=True)

    padded = (hw_true % tile) != 0            # static Python bool
    if padded:
        @pl.when(j < nj - 1)
        def _():                               # interior tiles: cheap unmasked max
            m = jnp.max(x, axis=1, keepdims=True).astype(jnp.float32)
            max_sc[...] = jnp.maximum(max_sc[...], m)

        @pl.when(j == nj - 1)
        def _():                               # last tile: mask the zero padding
            lane = jax.lax.broadcasted_iota(jnp.int32, x.shape, 1) + j * tile
            xm = jnp.where(lane < hw_true, x.astype(jnp.float32), -jnp.inf)
            max_sc[...] = jnp.maximum(max_sc[...], jnp.max(xm, axis=1, keepdims=True))
    else:
        m = jnp.max(x, axis=1, keepdims=True).astype(jnp.float32)
        max_sc[...] = jnp.maximum(max_sc[...], m)

    @pl.when(j == nj - 1)
    def _():
        pooled = sum_sc[...] * inv_hw + max_sc[...]
        v_ref[...] = jax.nn.sigmoid(_conv1d_same(pooled, w_ref, k))


def _mul_kernel(x_ref, v_ref, o_ref):
    """Pass 2 of the fallback: y = x * v broadcast over the spatial lanes."""
    x = x_ref[...]
    o_ref[...] = (x * v_ref[...].astype(x.dtype)).astype(o_ref.dtype)


# ------------------------------------------------------------------- wrapper

def channel_attention_conv(x, conv_weight, *, force_path=None, max_tile=None):
    """ECA channel attention: y = x * sigmoid(conv1d(avgpool(x) + maxpool(x))).

    x:            (N, C, H, W) float32 or bfloat16.
    conv_weight:  Conv1d(1, 1, k, bias=False) weight (any shape with k elements).
    force_path:   None | "fused" | "tiled"   (override for testing).
    max_tile:     optional cap (lanes) on the HW tile of the tiled path.
    """
    n, c, h, w = x.shape
    hw = h * w
    wt = jnp.asarray(conv_weight, dtype=jnp.float32).reshape(-1)
    k = int(wt.shape[0])
    itemsize = jnp.dtype(x.dtype).itemsize

    vmem_limit = int(_vmem_capacity_bytes() * 3 // 4)

    # Fused-path VMEM footprint: double-buffered (C, HW) in + out slabs at their
    # physical (8-sublane, 128-lane) layout, plus the f32 reduction temporary
    # when the input dtype is narrower than f32.
    cp = _round_up(c, 8)
    hwp_phys = _round_up(hw, 128)
    fused_bytes = 4 * cp * hwp_phys * itemsize
    if itemsize < 4:
        fused_bytes += cp * hwp_phys * 4
    use_fused = fused_bytes <= vmem_limit - (2 << 20)
    if force_path == "fused":
        use_fused = True
    elif force_path == "tiled":
        use_fused = False

    x_flat = x.reshape(n, c, hw)             # contiguity-preserving (free) reshape

    if use_fused:
        # Single pass, one full (C, HW) slab per batch element.  Block == full
        # array dims, so the (8,128) divisibility rule does not apply: no
        # wrapper pad, no output slice, no in-kernel masking.
        out_flat = pl.pallas_call(
            functools.partial(_fused_kernel, k=k, inv_hw=1.0 / hw),
            out_shape=jax.ShapeDtypeStruct((n, c, hw), x.dtype),
            grid_spec=pltpu.PrefetchScalarGridSpec(
                num_scalar_prefetch=0,
                grid=(n,),
                in_specs=[
                    pl.BlockSpec((pl.Squeezed(), c, hw), lambda i: (i, 0, 0)),
                    pl.BlockSpec(memory_space=pltpu.MemorySpace.SMEM),
                ],
                out_specs=pl.BlockSpec((pl.Squeezed(), c, hw), lambda i: (i, 0, 0)),
            ),
            compiler_params=pltpu.CompilerParams(
                dimension_semantics=("parallel",),
                vmem_limit_bytes=vmem_limit,
            ),
        )(x_flat, wt)
        return out_flat.reshape(n, c, h, w)

    # ---- Two-pass HW-tiled fallback: (C, H*W) slabs that overflow VMEM. ----
    head = 2 << 20
    avail = max(vmem_limit - head, 1 << 20)
    # Multiply pass holds 2 in + 2 out blocks of (c, tile) in flight.
    lane_budget = avail // (4 * c * itemsize)
    tile = max(128, (lane_budget // 128) * 128)
    if max_tile is not None:
        tile = max(128, min(tile, (int(max_tile) // 128) * 128))
    hwp = _round_up(hw, 128)
    if tile >= hwp:
        tile = hwp
    hwp = _round_up(hw, tile)
    num_t = hwp // tile

    if hwp != hw:
        # TODO(synk): the pad + trailing slice cost two extra full-tensor HBM
        # copies; removable via a cdiv grid with partial edge blocks once
        # boundary-block writeback is verified on hardware for this pattern.
        x_flat = jnp.pad(x_flat, ((0, 0), (0, 0), (0, hwp - hw)))

    v = pl.pallas_call(
        functools.partial(_reduce_kernel, k=k, hw_true=hw, inv_hw=1.0 / hw),
        out_shape=jax.ShapeDtypeStruct((n, c, 1), jnp.float32),
        grid_spec=pltpu.PrefetchScalarGridSpec(
            num_scalar_prefetch=0,
            grid=(n, num_t),
            in_specs=[
                pl.BlockSpec((pl.Squeezed(), c, tile), lambda i, j: (i, 0, j)),
                pl.BlockSpec(memory_space=pltpu.MemorySpace.SMEM),
            ],
            out_specs=pl.BlockSpec((pl.Squeezed(), c, 1), lambda i, j: (i, 0, 0)),
            scratch_shapes=[pltpu.VMEM((c, 1), jnp.float32),
                            pltpu.VMEM((c, 1), jnp.float32)],
        ),
        compiler_params=pltpu.CompilerParams(
            dimension_semantics=("parallel", "arbitrary"),
            vmem_limit_bytes=vmem_limit,
        ),
    )(x_flat, wt)

    out_flat = pl.pallas_call(
        _mul_kernel,
        out_shape=jax.ShapeDtypeStruct((n, c, hwp), x.dtype),
        grid_spec=pltpu.PrefetchScalarGridSpec(
            num_scalar_prefetch=0,
            grid=(n, num_t),
            in_specs=[
                pl.BlockSpec((pl.Squeezed(), c, tile), lambda i, j: (i, 0, j)),
                pl.BlockSpec((pl.Squeezed(), c, 1), lambda i, j: (i, 0, 0)),
            ],
            out_specs=pl.BlockSpec((pl.Squeezed(), c, tile), lambda i, j: (i, 0, j)),
        ),
        compiler_params=pltpu.CompilerParams(
            dimension_semantics=("parallel", "parallel"),
            vmem_limit_bytes=vmem_limit,
        ),
    )(x_flat, v)

    if hwp != hw:
        out_flat = out_flat[:, :, :hw]
    return out_flat.reshape(n, c, h, w)


# ----------------------------------------------------------------- reference

def _reference(x, conv_weight):
    """Plain-JAX reference mirroring the PyTorch forward (computed in f32)."""
    wt = jnp.asarray(conv_weight, dtype=jnp.float32).reshape(-1)
    k = wt.shape[0]
    pad = (k - 1) // 2
    xf = x.astype(jnp.float32)
    avg = jnp.mean(xf, axis=(2, 3))                           # (N, C)
    mx = jnp.max(xf, axis=(2, 3))                             # (N, C)

    def conv1d(seq):                                          # seq: (N, C)
        padded = jnp.pad(seq, ((0, 0), (pad, pad)))
        out = jnp.zeros_like(seq)
        for t in range(k):
            out = out + wt[t] * padded[:, t:t + seq.shape[1]]
        return out

    v = jax.nn.sigmoid(conv1d(avg) + conv1d(mx))              # (N, C)
    return xf * v[:, :, None, None]


if __name__ == "__main__":
    key = jax.random.PRNGKey(0)
    k_x, k_w, k_x2, k_x3 = jax.random.split(key, 4)

    N, C = 2, 8
    ksize = eca_kernel_size(C)                                # = 3 for C=8
    conv_weight = jax.random.normal(k_w, (ksize,), dtype=jnp.float32) * 0.5

    # 1) fused path, f32, lane-aligned spatial (16*16 = 256 lanes)
    x = jax.random.normal(k_x, (N, C, 16, 16), dtype=jnp.float32)
    y = jax.block_until_ready(channel_attention_conv(x, conv_weight))
    y_ref = _reference(x, conv_weight)
    assert y.shape == x.shape
    assert jnp.allclose(y, y_ref, atol=1e-5, rtol=1e-5), "fused f32 mismatch"

    # 2) fused path, non-128-multiple spatial (7*7 = 49): full-dim block, no pad
    x2 = jax.random.normal(k_x2, (N, C, 7, 7), dtype=jnp.float32)
    y2 = jax.block_until_ready(channel_attention_conv(x2, conv_weight))
    assert jnp.allclose(y2, _reference(x2, conv_weight), atol=1e-5, rtol=1e-5), \
        "fused unpadded-49 mismatch"

    # 3) forced two-pass HW-tiled fallback, padded last tile (13*13 = 169)
    x3 = jax.random.normal(k_x3, (N, C, 13, 13), dtype=jnp.float32)
    y3 = jax.block_until_ready(
        channel_attention_conv(x3, conv_weight, force_path="tiled", max_tile=128))
    assert jnp.allclose(y3, _reference(x3, conv_weight), atol=1e-5, rtol=1e-5), \
        "tiled padded fallback mismatch"

    # 4) forced tiled fallback, tile-aligned spatial (unmasked max branch)
    y4 = jax.block_until_ready(
        channel_attention_conv(x, conv_weight, force_path="tiled", max_tile=128))
    assert jnp.allclose(y4, y_ref, atol=1e-5, rtol=1e-5), "tiled aligned mismatch"

    # 5) bf16 I/O path (f32 pooling / v inside the kernel, bf16 multiply + output)
    xb = x.astype(jnp.bfloat16)
    yb = jax.block_until_ready(channel_attention_conv(xb, conv_weight))
    assert yb.dtype == jnp.bfloat16
    assert jnp.allclose(yb.astype(jnp.float32), _reference(xb, conv_weight),
                        atol=5e-2, rtol=5e-2), "bf16 mismatch"

    print("KERNEL_OK")
</pallas_src>

<mosaic_0001>
module attributes {stable_mosaic.version = 11 : i64} {
  func.func @_fused_kernel(%arg0: i32, %arg1: memref<1x8x256xf32, #tpu.memory_space<vmem>>, %arg2: memref<3xf32, #tpu.memory_space<smem>>, %arg3: memref<1x8x256xf32, #tpu.memory_space<vmem>>) attributes {dimension_semantics = [#tpu.dimension_semantics<parallel>], iteration_bounds = array<i64: 2>, scalar_prefetch = 0 : i64, scratch_operands = 0 : i64, tpu.core_type = #tpu.core_type<tc>, window_params = [{transform_indices = @transform_0, window_bounds = array<i64: 1, 8, 256>}, {transform_indices = @transform_1, window_bounds = array<i64: 3>}, {transform_indices = @transform_2, window_bounds = array<i64: 1, 8, 256>}]} {
    %c0 = arith.constant 0 : index
    %c0_0 = arith.constant 0 : index
    %c0_1 = arith.constant 0 : index
    %0 = vector.load %arg1[%c0, %c0_0, %c0_1] : memref<1x8x256xf32, #tpu.memory_space<vmem>>, vector<1x8x256xf32>
    %1 = vector.shape_cast %0 : vector<1x8x256xf32> to vector<8x256xf32>
    %cst = arith.constant dense<0.000000e+00> : vector<8xf32>
    %2 = vector.multi_reduction <add>, %1, %cst [1] : vector<8x256xf32> to vector<8xf32>
    %3 = vector.shape_cast %2 : vector<8xf32> to vector<8x1xf32>
    %cst_2 = arith.constant dense<0xFF800000> : vector<8xf32>
    %4 = vector.multi_reduction <maximumf>, %1, %cst_2 [1] : vector<8x256xf32> to vector<8xf32>
    %5 = vector.shape_cast %4 : vector<8xf32> to vector<8x1xf32>
    %cst_3 = arith.constant 3.906250e-03 : f32
    %6 = vector.broadcast %cst_3 : f32 to vector<8x1xf32>
    %7 = arith.mulf %3, %6 : vector<8x1xf32>
    %8 = arith.addf %7, %5 : vector<8x1xf32>
    %9 = tpu.iota {dimensions = array<i32: 0>} : vector<8x1xi32>
    %cst_4 = arith.constant 0.000000e+00 : f32
    %10 = vector.broadcast %cst_4 : f32 to vector<8x1xf32>
    %c1_i32 = arith.constant 1 : i32
    %11 = tpu.dynamic_rotate %8 by %c1_i32 dim 0 : vector<8x1xf32>, i32 -> vector<8x1xf32>
    %c-1_i32 = arith.constant -1 : i32
    %12 = vector.broadcast %c-1_i32 : i32 to vector<8x1xi32>
    %13 = arith.addi %9, %12 : vector<8x1xi32>
    %c0_i32 = arith.constant 0 : i32
    %14 = vector.broadcast %c0_i32 : i32 to vector<8x1xi32>
    %15 = arith.cmpi sge, %13, %14 : vector<8x1xi32>
    %c8_i32 = arith.constant 8 : i32
    %16 = vector.broadcast %c8_i32 : i32 to vector<8x1xi32>
    %17 = arith.cmpi slt, %13, %16 : vector<8x1xi32>
    %18 = arith.andi %15, %17 : vector<8x1xi1>
    %cst_5 = arith.constant 0.000000e+00 : f32
    %19 = vector.broadcast %cst_5 : f32 to vector<8x1xf32>
    %20 = arith.select %18, %11, %19 : vector<8x1xi1>, vector<8x1xf32>
    %c0_6 = arith.constant 0 : index
    %21 = memref.load %arg2[%c0_6] : memref<3xf32, #tpu.memory_space<smem>>
    %22 = vector.broadcast %21 : f32 to vector<8x1xf32>
    %23 = arith.mulf %22, %20 : vector<8x1xf32>
    %24 = arith.addf %10, %23 : vector<8x1xf32>
    %c1 = arith.constant 1 : index
    %25 = memref.load %arg2[%c1] : memref<3xf32, #tpu.memory_space<smem>>
    %26 = vector.broadcast %25 : f32 to vector<8x1xf32>
    %27 = arith.mulf %26, %8 : vector<8x1xf32>
    %28 = arith.addf %24, %27 : vector<8x1xf32>
    %c7_i32 = arith.constant 7 : i32
    %29 = tpu.dynamic_rotate %8 by %c7_i32 dim 0 : vector<8x1xf32>, i32 -> vector<8x1xf32>
    %c1_i32_7 = arith.constant 1 : i32
    %30 = vector.broadcast %c1_i32_7 : i32 to vector<8x1xi32>
    %31 = arith.addi %9, %30 : vector<8x1xi32>
    %c0_i32_8 = arith.constant 0 : i32
    %32 = vector.broadcast %c0_i32_8 : i32 to vector<8x1xi32>
    %33 = arith.cmpi sge, %31, %32 : vector<8x1xi32>
    %c8_i32_9 = arith.constant 8 : i32
    %34 = vector.broadcast %c8_i32_9 : i32 to vector<8x1xi32>
    %35 = arith.cmpi slt, %31, %34 : vector<8x1xi32>
    %36 = arith.andi %33, %35 : vector<8x1xi1>
    %cst_10 = arith.constant 0.000000e+00 : f32
    %37 = vector.broadcast %cst_10 : f32 to vector<8x1xf32>
    %38 = arith.select %36, %29, %37 : vector<8x1xi1>, vector<8x1xf32>
    %c2 = arith.constant 2 : index
    %39 = memref.load %arg2[%c2] : memref<3xf32, #tpu.memory_space<smem>>
    %40 = vector.broadcast %39 : f32 to vector<8x1xf32>
    %41 = arith.mulf %40, %38 : vector<8x1xf32>
    %42 = arith.addf %28, %41 : vector<8x1xf32>
    %43 = arith.negf %42 : vector<8x1xf32>
    %44 = math.exp %43 : vector<8x1xf32>
    %cst_11 = arith.constant 1.000000e+00 : f32
    %45 = vector.broadcast %cst_11 : f32 to vector<8x1xf32>
    %46 = arith.addf %45, %44 : vector<8x1xf32>
    %47 = arith.divf %45, %46 : vector<8x1xf32>
    %48 = vector.broadcast %47 : vector<8x1xf32> to vector<8x256xf32>
    %49 = arith.mulf %1, %48 : vector<8x256xf32>
    %c0_12 = arith.constant 0 : index
    %c0_13 = arith.constant 0 : index
    %c0_14 = arith.constant 0 : index
    %50 = vector.load %arg3[%c0_12, %c0_13, %c0_14] : memref<1x8x256xf32, #tpu.memory_space<vmem>>, vector<1x8x256xf32>
    %51 = vector.shape_cast %50 : vector<1x8x256xf32> to vector<8x256xf32>
    %52 = vector.shape_cast %49 : vector<8x256xf32> to vector<1x8x256xf32>
    tpu.vector_store %arg3[%c0_12, %c0_13, %c0_14], %52 {strides = array<i32>} : memref<1x8x256xf32, #tpu.memory_space<vmem>>, vector<1x8x256xf32>,
    return
  }
  func.func @transform_0(%arg0: i32) -> (i32, i32, i32) {
    %c0_i32 = arith.constant 0 : i32
    %c0_i32_0 = arith.constant 0 : i32
    %c0_i32_1 = arith.constant 0 : i32
    return %arg0, %c0_i32, %c0_i32_0 : i32, i32, i32
  }
  func.func @transform_1(%arg0: i32) -> i32 {
    %c0_i32 = arith.constant 0 : i32
    %c0_i32_0 = arith.constant 0 : i32
    return %c0_i32 : i32
  }
  func.func @transform_2(%arg0: i32) -> (i32, i32, i32) {
    %c0_i32 = arith.constant 0 : i32
    %c0_i32_0 = arith.constant 0 : i32
    %c0_i32_1 = arith.constant 0 : i32
    return %arg0, %c0_i32, %c0_i32_0 : i32, i32, i32
  }
}

</mosaic_0001>

<bundles_post_ra>
// kernel: tpu_custom_call.1
= control target key start
LH: loop header
LB: loop body
LE: loop exit
PB: predicated region body
PF: predicated region fallthrough
CT: control target
= control target key end

     0   :  { %7 = vsyncpa [#allocation3], 0  ;;  %s700_s0 = inlined_call_operand.hbm [shape: f32[2,8,256], index: 0, kind: input, shape index: {}]   ;;  %s701_s1 = inlined_call_operand.hbm [shape: f32[3], index: 1, kind: input, shape index: {}]   ;;  %s702_s2 = inlined_call_operand.hbm [shape: f32[2,8,256], index: 2, kind: output, shape index: {}]  }
   0x1   :  { %9 = vsyncpa [#allocation3 + $0x1], 0 }
   0x2   :  { %10 = vsyncpa [#allocation5], 0 }
   0x3   :  { %11 = vsyncpa [#allocation4], 0 }
   0x4   :  { %13 = vsyncpa [#allocation4 + $0x1], 0  ;;  %s558_s9 = smov 0   ;;  %s560_s10 = smov 0  }
   0x5   :  { %s562_s11 = smov 0   ;;  %s564_s12 = smov 0  }
   0x6 LB: > { %s579_s13 = sadd.s32 4294967295, %s539_s12   ;;  %s339_s14 = sadd.s32 4294967294, %s539_s12   ;;  %s539_s12 = sphi %s564_s12, %s712_s12   ;;  %s535_s11 = sphi %s562_s11, %s711_s11   ;;  %s531_s10 = sphi %s560_s10, %s710_s10   ;;  %s527_s9 = sphi %s558_s9, %s709_s9  }
   0x7   : > { %p39_p0 = scmp.ne.s32.totalorder %s531_s10, %s527_s9  ;;  %p40_p1 = scmp.eq.s32.totalorder %s579_s13, 0 }
   0x8   : > { %p84_p2 = scmp.eq.s32.totalorder %s579_s13, 1  ;;  %p90_p3 = scmp.eq.s32.totalorder %s339_s14, 1 }
   0x9   : > { %p588_p4 = por %p40_p1, %p39_p0  ;;  %p340_p5 = scmp.ge.s32.totalorder %s539_s12, 1 }
   0xa   : > { %p593_p6 = por %p90_p3, %p39_p0  ;;  %p97_p7 = scmp.lt.s32.totalorder %s539_s12, 3 }
   0xb   : > { %s109_s19 = sshll.u32 %s701_s1, 4  ;;  %s609_s21 = sadd.s32 1, %s539_s12   ;;  %s110_s19 = int_to_ptr.hbm [resolvable:$true] %s109_s19 }
   0xc   : > { %p601_p8 = pnand %p340_p5, %p97_p7  ;;  %s23_s22 = ssub.s32 %s539_s12, %s609_s21 }
   0xd   : > { %p24_p12 = scmp.eq.s32.totalorder %s23_s22, 0  ;;  %s26_s23 = sadd.s32 1, %s535_s11 }
   0xe   : > { %p368_p10 = pneg %p601_p8  ;;  %p33_p13 = scmp.ne.s32.totalorder %s535_s11, %s531_s10 }
   0xf   : > { %s541_s24 = smov [#allocation6]   ;;  %p34_p0 = scmp.eq.s32.totalorder %s539_s12, 0 }
  0x10   : > { %p369_p11 = pnand %p368_p10, %p40_p1  ;;  %p624_p3 = por %p84_p2, %p33_p13 }
  0x11   : > { %s619_s25 = scalar_select %p24_p12, %s535_s11, %s26_s23  }
  0x12   : > { %371 = dma.hbm_to_smem (!%p369_p11), %s110_s19, 16, %s541_s24, [#allocation5]  }
  0x13   : > { %s120_s27 = sand.u32 1, %s535_s11   ;;  %p35_p5 = por %p34_p0, %p33_p13 }
  0x14   : > { %p381_p7 = scmp.lt.s32.totalorder %s539_s12, 2  ;;  %s343_s28 = sshll.u32 %s120_s27, 4 }
  0x15   : > { %s358_s29 = sshll.u32 %s539_s12, 4  ;;  %s124_s6 = scalar_lea.vmem [#allocation2], %s343_s28 }
  0x16   : > { %s129_s4 = scalar_lea.hbm %s700_s0, %s358_s29  ;;  %s133_s7 = sshll.u32 %s124_s6, 4  ;;  %s134_s7 = int_to_ptr.vmem [resolvable:$true] %s133_s7 }
  0x17   : > { %s131_s5 = sshll.u32 %s129_s4, 4  ;;  %p634_p10 = pnand %p381_p7, %p35_p5  ;;  %s132_s5 = int_to_ptr.hbm [resolvable:$true] %s131_s5 }
  0x18   : > { %s121_s14 = scalar_lea.sflag [#allocation3], %s120_s27  ;;  %s439_s17 = sshra.s32 %s132_s5, 4  ;;  %s440_s17 = int_to_ptr.hbm [resolvable:$true] %s439_s17 }
  0x19   : > { %s441_s18 = scalar_lea.hbm %s440_s17, 16  ;;  %p443_p11 = pneg %p634_p10 }
  0x1a   : > { %p442_p2 = scmp.ne.s32.totalorder %s440_s17, %s441_s18  ;;  %s446_s23 = scalar_lea.hbm %s700_s0, 32 }
  0x1b   : > { %p447_p0 = scmp.lt.s32.totalorder %s440_s17, %s700_s0  ;;  %p448_p5 = scmp.lt.s32.totalorder %s446_s23, %s441_s18 }
  0x1c   : > { %p444_p12 = pnand %p443_p11, %p442_p2 }
  0x1d   : > { %p449_p7 = por %p448_p5, %p447_p0 }
  0x1e   : > { %p445_p13 = pneg %p444_p12 }
  0x20   : > { %p450_p9 = pnand %p449_p7, %p445_p13 }
  0x22   : > { %453 = shalt.err (!%p450_p9)
}
  0x23   : > { %375 = dma.hbm_to_vmem [thread:$0]  (!%p634_p10), %s132_s5, 256, %s134_s7, %s121_s14  }
  0x24   : > { %142 = sbr.rel (%p601_p8) target bundleno = 333 (0x14d), region = 28  ;;  %s651_s27 = sand.u32 (!%p601_p8), 1, %s531_s10  }
  0x25   : > { %s347_s29 = sshll.u32 (!%p601_p8), %s651_s27, 4  ;;  %s145_s30 = scalar_lea.sflag (!%p601_p8), [#allocation3], %s651_s27 }
  0x26   : > { %s148_s3 = scalar_lea.vmem (!%p601_p8), [#allocation2], %s347_s29 }
  0x29   : > { %514 = dma.done.wait (%p588_p4), %s145_s30, 256  }
  0x2a   : > { %516 = vsyncadd (%p588_p4), %s145_s30, 4294967040 }
  0x2b   : > { %518 = dma.done.wait (%p40_p1), [#allocation5], 16  }
  0x2c   : > { %520 = vsyncadd (%p40_p1), [#allocation5], 4294967280 }
  0x2d   : > { %159 = sfence }
  0x2e   : > { %v176_v0 = vld [vmem:[%s148_s3] sm:$0xff]  ;;  %v177_v1 = vld [vmem:[%s148_s3 + $0x8] sm:$0xff]  ;;  %v186_v4 = vlaneseq  ;;  %v542_v6 = vmov 0   ;;  %s194_s15 = sld [smem:[#allocation6]]  ;;  %s359_s5 = sshll.u32 %s579_s13, 4 }
  0x2f   : > { %v178_v2 = vadd.f32 %v177_v1, %v176_v0  ;;  %v181_v3 = vmax.f32 %v176_v0, %v177_v1  ;;  %418 = vset.pattern.permute.xlu1 %v542_v6  ;;  %419 = vset.pattern.permute.xlu0 %v542_v6  ;;  %s350_s20 = sld [smem:[#allocation6 + $0x1]]  ;;  %s252_s8 = scalar_lea.hbm %s702_s2, %s359_s5 }
  0x30   : > { %v187_v7 = vshrl.u32 %v186_v4, 7  ;;  %s351_s4 = sld [smem:[#allocation6 + $0x2]]  ;;  %s175_s14 = scalar_lea.vmem [#allocation7], %s347_s29 }
  0x31   : > { %179 = vadd.xlane.f32.xlu0 %v178_v2  ;;  %s254_s17 = sshll.u32 %s175_s14, 4  ;;  %s256_s18 = sshll.u32 %s252_s8, 4  ;;  %s255_s17 = int_to_ptr.vmem [resolvable:$true] %s254_s17  ;;  %s257_s18 = int_to_ptr.hbm [resolvable:$true] %s256_s18 }
  0x32   : > { %v189_v8 = vadd.s32 4294967295, %v187_v7  ;;  %v203_v9 = vadd.s32 1, %v187_v7  ;;  %s241_s19 = scalar_lea.sflag [#allocation4], %s651_s27  ;;  %s483_s22 = sshra.s32 %s257_s18, 4  ;;  %s484_s22 = int_to_ptr.hbm [resolvable:$true] %s483_s22 }
  0x33   : > { %s485_s13 = scalar_lea.hbm %s484_s22, 16  ;;  %s489_s28 = scalar_lea.hbm %s702_s2, 32 }
  0x34   : > { %vm190_vm0 = vcmp.ge.s32.totalorder %v189_v8, 0  ;;  %vm205_vm1 = vcmp.lt.s32.totalorder %v203_v9, 8  ;;  %v195_v13 = vstv %s194_s15  ;;  %p486_p1 = scmp.ne.s32.totalorder %s484_s22, %s485_s13  ;;  %p490_p9 = scmp.lt.s32.totalorder %s484_s22, %s702_s2 }
  0x35   : > { %v199_v14 = vstv %s350_s20  ;;  %p491_p10 = scmp.lt.s32.totalorder %s489_s28, %s485_s13 }
  0x36   : > { %v209_v17 = vstv %s351_s4  ;;  %p487_p4 = pnand %p486_p1, %p624_p3 }
  0x37   : > { %p492_p2 = por %p491_p10, %p490_p9 }
  0x38   : > { %p488_p8 = pneg %p487_p4 }
  0x39   : > { %182 = vmax.xlane.f32.xlu0 %v181_v3 }
  0x3a   : > { %p493_p11 = pnand %p492_p2, %p488_p8 }
  0xa4   : > { %v180_v5 = vpop.xlane.xlu0 %179 }
  0xa5   : > { %v184_v10 = vmul.f32 0.00390625, %v180_v5 }
  0xac   : > { %v183_v11 = vpop.xlane.xlu0 %182 }
  0xad   : > { %v185_v12 = vadd.f32 %v184_v10, %v183_v11 }
  0xaf   : > { %v188_v15 = vrot.slane %v185_v12, 7  ;;  %v202_v16 = vrot.slane %v185_v12, 1  ;;  %v200_v21 = vmul.f32 %v199_v14, %v185_v12 }
  0xb1   : > { %v193_v18 = vsel %vm190_vm0, %v188_v15, 0.0  ;;  %v207_v19 = vsel %vm205_vm1, %v202_v16, 0.0 }
  0xb2   : > { %v196_v20 = vmul.f32 %v195_v13, %v193_v18  ;;  %v210_v23 = vmul.f32 %v209_v17, %v207_v19 }
  0xb4   : > { %v201_v22 = vadd.f32 %v200_v21, %v196_v20 }
  0xb6   : > { %v211_v24 = vadd.f32 %v210_v23, %v201_v22 }
  0xb8   : > { %v352_v25 = vmul.f32 -1.442695, %v211_v24 }
  0xba   : > { %420 = vpow2.f32 %v352_v25 }
  0xc0   : > { %v421_v26 = vpop.eup %420 }
  0xc1   : > { %v215_v27 = vadd.f32 1.0, %v421_v26 }
  0xc3   : > { %422 = vrcp.f32 %v215_v27  ;;  %v227_v31 = vand.u32 2147483648, %v215_v27  ;;  %v225_v33 = vand.u32 2147483647, %v215_v27  ;;  %vm221_vm3 = vweird.f32 %v215_v27 }
  0xc5   : > { %v228_v35 = vor.u32 1.1754944e-38, %v227_v31  ;;  %vm226_vm5 = vcmp.eq.f32.partialorder %v225_v33, 8.507059e+37 }
  0xc9   : > { %v423_v28 = vpop.eup %422 }
  0xca   : > { %v217_v29 = vmul.f32 %v423_v28, %v215_v27  ;;  %vm222_vm2 = vweird.f32 %v423_v28 }
  0xcb   : > { %vm223_vm4 = vmor %vm221_vm3, %vm222_vm2 }
  0xcc   : > { %v218_v30 = vsub.f32 1.0, %v217_v29 }
  0xce   : > { %v219_v32 = vmul.f32 %v423_v28, %v218_v30 }
  0xd0   : > { %v220_v34 = vadd.f32 %v423_v28, %v219_v32 }
  0xd2   : > { %v224_v36 = vsel %vm223_vm4, %v423_v28, %v220_v34 }
  0xd3   : > { %v229_v37 = vsel %vm226_vm5, %v228_v35, %v224_v36 }
  0xd4   : > { %233 = vperm.xlu1 %418, %v229_v37  }
 0x146   : > { %v234_v38 = vpop.permute.xlu1 %233 }
 0x147   : > { %v236_v39 = vmul.f32 %v234_v38, %v176_v0  ;;  %v237_v40 = vmul.f32 %v234_v38, %v177_v1 }
 0x149   : > { %238 = vst [vmem:[%s175_s14] sm:$0xff] %v236_v39 }
 0x14a   : > { %239 = vst [vmem:[%s175_s14 + $0x8] sm:$0xff] %v237_v40 }
 0x14b   : > { %496 = shalt.err (!%p493_p11)
}
 0x14c   : > { %366 = dma.vmem_to_hbm [thread:$0]  (%p624_p3), %s255_s17, 256, %s257_s18, %s241_s19  }
 0x14d PF: > { %s268_s27 = sand.u32 1, %s527_s9   ;;  %p708_p12 = scmp.ge.s32.totalorder %s539_s12, 2 }
 0x14e   : > { %s269_s3 = scalar_lea.sflag [#allocation4], %s268_s27 }
 0x14f   : > { %p377_p13 = pnand %p708_p12, %p593_p6 }
 0x151   : > { %p378_p0 = pneg %p377_p13 }
 0x153   : > { %522 = dma.done.wait (%p378_p0), %s269_s3, 256  }
 0x154   : > { %524 = vsyncadd (%p378_p0), %s269_s3, 4294967040  ;;  %p16_p5 = scmp.ge.s32.totalorder %s609_s21, 4   ;;  %s709_s9 = smov %s531_s10 }
 0x155   : > { %s710_s10 = smov %s535_s11  ;;  %s711_s11 = smov %s619_s25 }
 0x156   : > { %s712_s12 = smov %s609_s21  ;;  %18 = sbr.rel (!%p16_p5) target bundleno = 6 (0x6), region = 78 }
 0x15b   :  { %275 = vsyncpa [#allocation3], 1 }
 0x15c   :  { %277 = vsyncpa [#allocation3 + $0x1], 1 }
 0x15d   :  { %278 = vsyncpa [#allocation4], 1 }
 0x15e   :  { %280 = vsyncpa [#allocation4 + $0x1], 1 }
 0x15f   :  { %281 = vsyncpa [#allocation5], 1 }
 0x160   :  { %283 = vsyncpa [#allocation5 + $0x1], 1 }

</bundles_post_ra>
